<compile_context>
chip_gen: v7x
topology: tpu7x:2x2x1
jax: 0.10.0
libtpu: 0.0.40
codegen_flags: <defaults>
</compile_context>

<pallas_src>
import jax
import jax.numpy as jnp
from jax.experimental import pallas as pl
from jax.experimental.pallas import tpu as pltpu

_SUBLANE = 8


def _round_up(n, m):
    return -(-n // m) * m


def _mlp_kernel(x_ref, w1_ref, b1_ref, w2_ref, b2_ref, o_ref):
    # Fused hot path: matmul -> bias -> relu -> matmul -> bias -> sigmoid,
    # all on VMEM-resident tiles. Mosaic pads the small feature dims to
    # (8,128) vregs internally; no HBM traffic is spent on that padding.
    x = x_ref[...]
    h = jnp.dot(x, w1_ref[...], preferred_element_type=jnp.float32)
    h = jnp.maximum(h + b1_ref[...], 0.0)                 # (TB, H) + (1, H)
    y = jnp.dot(h.astype(w2_ref.dtype), w2_ref[...],
                preferred_element_type=jnp.float32)
    y = y + b2_ref[...]                                   # (TB, O) + (1, O)
    # sigmoid(y) = 1 / (1 + exp(-y)); exp on EUP, reciprocal kept explicit.
    y = pl.reciprocal(1.0 + jnp.exp(-y), approx=False)
    o_ref[...] = y.astype(o_ref.dtype)


def _mlp_forward_pallas(x, w1, b1, w2, b2, *, block_b=1024):
    """x: (B, K); w1: (K, H); b1: (H,); w2: (H, O); b2: (O,)."""
    B, K = x.shape
    H = w1.shape[1]
    O = w2.shape[1]

    b1_2d = b1.reshape(1, H)
    b2_2d = b2.reshape(1, O)

    # Batch tile: multiple of 8 sublanes. Cap at ceil(B/2) (rounded up to 8)
    # so the grid has >= 2 steps whenever B > 8 -> megacore (v7x) gets work
    # on both TensorCores; harmless on single-TC v5e/v6e.
    half_b = _round_up(pl.cdiv(B, 2), _SUBLANE)
    TB = max(_SUBLANE, min(_round_up(block_b, _SUBLANE), half_b))
    grid = (pl.cdiv(B, TB),)

    out = pl.pallas_call(
        _mlp_kernel,
        out_shape=jax.ShapeDtypeStruct((B, O), x.dtype),
        grid_spec=pl.GridSpec(
            grid=grid,
            in_specs=[
                # x: tiled along batch only; last block dim == full K (legal,
                # no lane padding materialized in HBM).
                pl.BlockSpec((TB, K), lambda i: (i, 0)),
                # Weights/biases: constant index_map -> VMEM-resident across
                # all grid steps.
                pl.BlockSpec((K, H), lambda i: (0, 0)),
                pl.BlockSpec((1, H), lambda i: (0, 0)),
                pl.BlockSpec((H, O), lambda i: (0, 0)),
                pl.BlockSpec((1, O), lambda i: (0, 0)),
            ],
            # Output written unpadded: O useful lanes only (no 16x write amp,
            # no post-slice pass). Ragged last batch block is masked on store.
            out_specs=pl.BlockSpec((TB, O), lambda i: (i, 0)),
        ),
        compiler_params=pltpu.CompilerParams(
            # Batch axis is embarrassingly parallel -> megacore sharding.
            dimension_semantics=("parallel",),
        ),
    )(x, w1, b1_2d, w2, b2_2d)

    return out


def reference_forward(x, w1, b1, w2, b2):
    h = jnp.maximum(x @ w1 + b1, 0.0)
    return jax.nn.sigmoid(h @ w2 + b2)


def mlp_forward(x, w1, b1, w2, b2, *, block_b=1024, min_pallas_batch=1024):
    """Dispatch: tiny batches go to plain XLA (kernel launch overhead would
    dominate); larger batches use the fused Pallas kernel."""
    B = x.shape[0]
    if B < max(min_pallas_batch, _SUBLANE):
        return reference_forward(x, w1, b1, w2, b2)
    return _mlp_forward_pallas(x, w1, b1, w2, b2, block_b=block_b)


if __name__ == "__main__":
    # Small shapes consistent with the module: Linear -> ReLU -> Linear -> Sigmoid.
    batch, input_size, hidden_size, output_size = 64, 16, 32, 8

    key = jax.random.PRNGKey(0)
    kx, kw1, kb1, kw2, kb2 = jax.random.split(key, 5)

    x = jax.random.normal(kx, (batch, input_size), dtype=jnp.float32)
    # Deterministic synthetic params (PyTorch-like uniform init scale).
    w1 = jax.random.uniform(kw1, (input_size, hidden_size), jnp.float32,
                            -1.0 / input_size**0.5, 1.0 / input_size**0.5)
    b1 = jax.random.uniform(kb1, (hidden_size,), jnp.float32,
                            -1.0 / input_size**0.5, 1.0 / input_size**0.5)
    w2 = jax.random.uniform(kw2, (hidden_size, output_size), jnp.float32,
                            -1.0 / hidden_size**0.5, 1.0 / hidden_size**0.5)
    b2 = jax.random.uniform(kb2, (output_size,), jnp.float32,
                            -1.0 / hidden_size**0.5, 1.0 / hidden_size**0.5)

    # Force the Pallas path (threshold 0) so the kernel itself is exercised.
    y = mlp_forward(x, w1, b1, w2, b2, min_pallas_batch=0)
    y = jax.block_until_ready(y)
    y_ref = reference_forward(x, w1, b1, w2, b2)
    assert y.shape == (batch, output_size)
    assert jnp.allclose(y, y_ref, atol=1e-5, rtol=1e-5)

    # Ragged batch (not a multiple of the tile) — exercises cdiv masking.
    xr = x[:37]
    yr = jax.block_until_ready(mlp_forward(xr, w1, b1, w2, b2, min_pallas_batch=0))
    yr_ref = reference_forward(xr, w1, b1, w2, b2)
    assert yr.shape == (37, output_size)
    assert jnp.allclose(yr, yr_ref, atol=1e-5, rtol=1e-5)

    # Tiny-batch dispatcher path (plain XLA fallback).
    ys = jax.block_until_ready(mlp_forward(x[:4], w1, b1, w2, b2))
    assert jnp.allclose(ys, reference_forward(x[:4], w1, b1, w2, b2),
                        atol=1e-5, rtol=1e-5)

    print("KERNEL_OK")
</pallas_src>

<mosaic_0001>
module attributes {stable_mosaic.version = 11 : i64} {
  func.func @_mlp_kernel(%arg0: i32, %arg1: memref<32x16xf32, #tpu.memory_space<vmem>>, %arg2: memref<16x32xf32, #tpu.memory_space<vmem>>, %arg3: memref<1x32xf32, #tpu.memory_space<vmem>>, %arg4: memref<32x8xf32, #tpu.memory_space<vmem>>, %arg5: memref<1x8xf32, #tpu.memory_space<vmem>>, %arg6: memref<32x8xf32, #tpu.memory_space<vmem>>) attributes {dimension_semantics = [#tpu.dimension_semantics<parallel>], iteration_bounds = array<i64: 2>, scalar_prefetch = 0 : i64, scratch_operands = 0 : i64, tpu.core_type = #tpu.core_type<tc>, window_params = [{transform_indices = @transform_0, window_bounds = array<i64: 32, 16>}, {pipeline_mode = #tpu.pipeline_mode<synchronous>, transform_indices = @transform_1, window_bounds = array<i64: 16, 32>}, {pipeline_mode = #tpu.pipeline_mode<synchronous>, transform_indices = @transform_2, window_bounds = array<i64: 1, 32>}, {pipeline_mode = #tpu.pipeline_mode<synchronous>, transform_indices = @transform_3, window_bounds = array<i64: 32, 8>}, {pipeline_mode = #tpu.pipeline_mode<synchronous>, transform_indices = @transform_4, window_bounds = array<i64: 1, 8>}, {transform_indices = @transform_5, window_bounds = array<i64: 32, 8>}]} {
    %c0 = arith.constant 0 : index
    %c0_0 = arith.constant 0 : index
    %0 = vector.load %arg1[%c0, %c0_0] : memref<32x16xf32, #tpu.memory_space<vmem>>, vector<32x16xf32>
    %c0_1 = arith.constant 0 : index
    %c0_2 = arith.constant 0 : index
    %1 = vector.load %arg2[%c0_1, %c0_2] : memref<16x32xf32, #tpu.memory_space<vmem>>, vector<16x32xf32>
    %cst = arith.constant dense<0.000000e+00> : vector<32x32xf32>
    %2 = tpu.matmul %0, %1, %cst {dimension_numbers = #tpu.dot_dimension_numbers<[1], [0], [0], [1], [0, 0, 1, 1], [], []>} : vector<32x16xf32>, vector<16x32xf32>, vector<32x32xf32> -> vector<32x32xf32>
    %c0_3 = arith.constant 0 : index
    %c0_4 = arith.constant 0 : index
    %3 = vector.load %arg3[%c0_3, %c0_4] : memref<1x32xf32, #tpu.memory_space<vmem>>, vector<1x32xf32>
    %4 = vector.broadcast %3 : vector<1x32xf32> to vector<32x32xf32>
    %5 = arith.addf %2, %4 : vector<32x32xf32>
    %cst_5 = arith.constant 0.000000e+00 : f32
    %6 = vector.broadcast %cst_5 : f32 to vector<32x32xf32>
    %7 = arith.maximumf %5, %6 : vector<32x32xf32>
    %c0_6 = arith.constant 0 : index
    %c0_7 = arith.constant 0 : index
    %8 = vector.load %arg4[%c0_6, %c0_7] : memref<32x8xf32, #tpu.memory_space<vmem>>, vector<32x8xf32>
    %cst_8 = arith.constant dense<0.000000e+00> : vector<32x8xf32>
    %9 = tpu.matmul %7, %8, %cst_8 {dimension_numbers = #tpu.dot_dimension_numbers<[1], [0], [0], [1], [0, 0, 1, 1], [], []>} : vector<32x32xf32>, vector<32x8xf32>, vector<32x8xf32> -> vector<32x8xf32>
    %c0_9 = arith.constant 0 : index
    %c0_10 = arith.constant 0 : index
    %10 = vector.load %arg5[%c0_9, %c0_10] : memref<1x8xf32, #tpu.memory_space<vmem>>, vector<1x8xf32>
    %11 = vector.broadcast %10 : vector<1x8xf32> to vector<32x8xf32>
    %12 = arith.addf %9, %11 : vector<32x8xf32>
    %cst_11 = arith.constant 0.000000e+00 : f32
    %13 = vector.broadcast %cst_11 : f32 to vector<32x8xf32>
    %14 = arith.subf %13, %12 : vector<32x8xf32>
    %15 = math.exp %14 : vector<32x8xf32>
    %cst_12 = arith.constant 1.000000e+00 : f32
    %16 = vector.broadcast %cst_12 : f32 to vector<32x8xf32>
    %17 = arith.addf %16, %15 : vector<32x8xf32>
    %18 = tpu.reciprocal %17 : vector<32x8xf32> -> vector<32x8xf32>
    %c0_13 = arith.constant 0 : index
    %c0_14 = arith.constant 0 : index
    %19 = vector.load %arg6[%c0_13, %c0_14] : memref<32x8xf32, #tpu.memory_space<vmem>>, vector<32x8xf32>
    tpu.vector_store %arg6[%c0_13, %c0_14], %18 {strides = array<i32>} : memref<32x8xf32, #tpu.memory_space<vmem>>, vector<32x8xf32>,
    return
  }
  func.func @transform_0(%arg0: i32) -> (i32, i32) {
    %c0_i32 = arith.constant 0 : i32
    %c0_i32_0 = arith.constant 0 : i32
    return %arg0, %c0_i32 : i32, i32
  }
  func.func @transform_1(%arg0: i32) -> (i32, i32) {
    %c0_i32 = arith.constant 0 : i32
    %c0_i32_0 = arith.constant 0 : i32
    %c0_i32_1 = arith.constant 0 : i32
    return %c0_i32, %c0_i32_0 : i32, i32
  }
  func.func @transform_2(%arg0: i32) -> (i32, i32) {
    %c0_i32 = arith.constant 0 : i32
    %c0_i32_0 = arith.constant 0 : i32
    %c0_i32_1 = arith.constant 0 : i32
    return %c0_i32, %c0_i32_0 : i32, i32
  }
  func.func @transform_3(%arg0: i32) -> (i32, i32) {
    %c0_i32 = arith.constant 0 : i32
    %c0_i32_0 = arith.constant 0 : i32
    %c0_i32_1 = arith.constant 0 : i32
    return %c0_i32, %c0_i32_0 : i32, i32
  }
  func.func @transform_4(%arg0: i32) -> (i32, i32) {
    %c0_i32 = arith.constant 0 : i32
    %c0_i32_0 = arith.constant 0 : i32
    %c0_i32_1 = arith.constant 0 : i32
    return %c0_i32, %c0_i32_0 : i32, i32
  }
  func.func @transform_5(%arg0: i32) -> (i32, i32) {
    %c0_i32 = arith.constant 0 : i32
    %c0_i32_0 = arith.constant 0 : i32
    return %arg0, %c0_i32 : i32, i32
  }
}

</mosaic_0001>

<bundles_post_ra>
// kernel: tpu_custom_call.1
= control target key start
LH: loop header
LB: loop body
LE: loop exit
PB: predicated region body
PF: predicated region fallthrough
CT: control target
= control target key end

     0   :  { %s666_s18 = smov 0   ;;  %s714_s0 = inlined_call_operand.vmem [shape: f32[64,16], index: 0, kind: input, shape index: {}]   ;;  %s715_s1 = inlined_call_operand.vmem [shape: f32[16,32], index: 1, kind: input, shape index: {}]   ;;  %s716_s2 = inlined_call_operand.vmem [shape: f32[1,32], index: 2, kind: input, shape index: {}]   ;;  %s717_s3 = inlined_call_operand.vmem [shape: f32[32,8], index: 3, kind: input, shape index: {}]   ;;  %s718_s4 = inlined_call_operand.vmem [shape: f32[1,8], index: 4, kind: input, shape index: {}]   ;;  %s719_s5 = inlined_call_operand.vmem [shape: f32[64,8], index: 5, kind: output, shape index: {}]  }
   0x1 LB: > { %s533_s19 = sadd.s32 4294967295, %s634_s18   ;;  %p537_p0 = scmp.ge.s32.totalorder %s634_s18, 1  ;;  %s634_s18 = sphi %s666_s18, %s15_s18  }
   0x2   : > { %p188_p1 = scmp.lt.s32.totalorder %s634_s18, 3 }
   0x4   : > { %p189_p2 = pnand %p537_p0, %p188_p1 }
   0x5   : > { %v232_v0 = vld [vmem:[%s715_s1] sm:$0xff] (!%p189_p2)  ;;  %v233_v1 = vld [vmem:[%s715_s1 + $0x8] sm:$0xff] (!%p189_p2)  ;;  %s538_s24 = sshll.u32 (!%p189_p2), %s533_s19, 2  ;;  %vm241_vm0 = vcmask (!%p189_p2), 130048   ;;  %v345_v10 = vld [vmem:[%s717_s3 + $0x10] sm:$0xff] (!%p189_p2)  ;;  %vm354_vm1 = vcmask (!%p189_p2), 261120  }
   0x6   : > { %192 = sbr.rel (%p189_p2) target bundleno = 485 (0x1e5), region = 40  ;;  %v343_v2 = vld [vmem:[%s717_s3] sm:$0xff] (!%p189_p2)  ;;  %v592_v3 = vpack.c.bf16 (!%p189_p2), %v233_v1, %v232_v0  ;;  %p217_p3 = scmp.lt.s32.totalorder (!%p189_p2), %s538_s24, 7  ;;  %v344_v4 = vld [vmem:[%s717_s3 + $0x8] sm:$0xff] (!%p189_p2)  ;;  %v346_v11 = vld [vmem:[%s717_s3 + $0x18] sm:$0xff] (!%p189_p2)  ;;  %vm472_vm2 = vcmask (!%p189_p2), 64512  }
   0x7   : > { %v596_v5 = vpack.c.bf16 (!%p189_p2), %v344_v4, %v343_v2  ;;  %v600_v12 = vpack.c.bf16 (!%p189_p2), %v346_v11, %v345_v10  ;;  %v542_v13 = vld [vmem:[%s716_s2] ss:$0 sm:$0xff] (!%p189_p2) }
   0x8   : > { %593 = vmatprep.subr.bf16.mxu0 (!%p189_p2), %v592_v3  ;;  %v547_v26 = vld [vmem:[%s718_s4] ss:$0 sm:$0xff] (!%p189_p2) }
   0x9   : > { %595 = vmatpush3.bf16.msra.mxu0 (!%p189_p2), %v592_v3  ;;  %597 = vmatprep.subr.bf16.mxu1 (!%p189_p2), %v596_v5 }
   0xa   : > { %599 = vmatpush3.bf16.msra.mxu1 (!%p189_p2), %v596_v5 }
   0xb   : > { %601 = vmatprep.subr.bf16.mxu1 (!%p189_p2), %v600_v12 }
   0xd   : > { %s721_s24 = smov (!%p217_p3, %s538_s24), 7 }
   0xe   : > { %s539_s29 = sshll.u32 %s721_s24, 3  ;;  %603 = vmatpush3.bf16.msra.mxu1 %v600_v12 }
   0xf   : > { %s220_s7 = scalar_lea.vmem %s714_s0, %s539_s29  ;;  %s226_s19 = scalar_lea.vmem %s719_s5, %s539_s29 }
  0x10   : > { %v228_v6 = vld [vmem:[%s220_s7] sm:$0xff]  ;;  %v229_v7 = vld [vmem:[%s220_s7 + $0x8] sm:$0xff]  ;;  %v230_v8 = vld [vmem:[%s220_s7 + $0x10] sm:$0xff] }
  0x11   : > { %572 = vmatprep.mubr.msk.f32.mxu0 %vm241_vm0, %v228_v6  ;;  %v231_v9 = vld [vmem:[%s220_s7 + $0x18] sm:$0xff] }
  0x12   : > { %573 = vmatmul.mubr.msk.f32.vlgmr.msra.gmra.mrb[0].mxu0 %vm241_vm0, %v229_v7 }
  0x13   : > { %575 = vmatprep.mubr.msk.f32.mxu0 %vm241_vm0, %v230_v8 }
  0x16   : > { %576 = vmatmul.mubr.msk.f32.gmra.mrb[2].mxu0 %vm241_vm0, %v231_v9 }
  0xe5   : > { %v574_v14 = vpop.f32.mrb[0].mxu0 }
  0xe6   : > { %v326_v15 = vadd.f32 %v574_v14, %v542_v13  ;;  %v320_v16 = vpop.f32.mrb[1].mxu0 }
  0xe7   : > { %v321_v17 = vadd.f32 %v542_v13, %v320_v16 }
  0xe8   : > { %v340_v20 = vmax.f32 %v326_v15, 0.0 }
  0xe9   : > { %v339_v18 = vmax.f32 %v321_v17, 0.0  ;;  %v577_v19 = vpop.f32.mrb[2].mxu0 }
  0xea   : > { %v336_v21 = vadd.f32 %v577_v19, %v542_v13  ;;  %v330_v22 = vpop.f32.mrb[3].mxu0 }
  0xeb   : > { %v331_v23 = vadd.f32 %v542_v13, %v330_v22  ;;  %586 = vmatprep.mubr.msk.f32.mxu1 %vm354_vm1, %v339_v18 }
  0xec   : > { %587 = vmatmul.mubr.msk.f32.vlgmr.msra.gmra.mrb[0].mxu1 %vm354_vm1, %v340_v20  ;;  %v342_v25 = vmax.f32 %v336_v21, 0.0 }
  0xed   : > { %v341_v24 = vmax.f32 %v331_v23, 0.0 }
  0xef   : > { %589 = vmatprep.mubr.msk.f32.mxu1 %vm354_vm1, %v341_v24 }
  0xf0   : > { %590 = vmatmul.mubr.msk.f32.gmra.mrb[2].mxu1 %vm354_vm1, %v342_v25 }
 0x1bf   : > { %v588_v27 = vpop.f32.mrb[0].mxu1 }
 0x1c0   : > { %v439_v28 = vadd.f32 %v588_v27, %v547_v26  ;;  %v433_v29 = vpop.f32.mrb[1].mxu1 }
 0x1c1   : > { %v434_v30 = vadd.f32 %v547_v26, %v433_v29 }
 0x1c2   : > { %v453_v31 = vsub.f32 0.0, %v439_v28 }
 0x1c3   : > { %v452_v32 = vsub.f32 0.0, %v434_v30  ;;  %v591_v33 = vpop.f32.mrb[2].mxu1 }
 0x1c4   : > { %v458_v34 = vmul.f32 1.442695, %v453_v31  ;;  %v449_v35 = vadd.f32 %v591_v33, %v547_v26  ;;  %v443_v36 = vpop.f32.mrb[3].mxu1 }
 0x1c5   : > { %v456_v37 = vmul.f32 1.442695, %v452_v32  ;;  %v444_v38 = vadd.f32 %v547_v26, %v443_v36 }
 0x1c6   : > { %612 = vpow2.f32 %v458_v34  ;;  %v455_v39 = vsub.f32 0.0, %v449_v35 }
 0x1c7   : > { %614 = vpow2.f32 %v456_v37  ;;  %v454_v40 = vsub.f32 0.0, %v444_v38 }
 0x1c8   : > { %v462_v41 = vmul.f32 1.442695, %v455_v39 }
 0x1c9   : > { %v460_v42 = vmul.f32 1.442695, %v454_v40 }
 0x1ca   : > { %616 = vpow2.f32 %v462_v41 }
 0x1cb   : > { %618 = vpow2.f32 %v460_v42 }
 0x1d0   : > { %v613_v43 = vpop.eup %612 }
 0x1d1   : > { %v615_v44 = vpop.eup %614  ;;  %v465_v45 = vadd.f32 1.0, %v613_v43 }
 0x1d2   : > { %v464_v46 = vadd.f32 1.0, %v615_v44 }
 0x1d4   : > { %v617_v47 = vpop.eup %616  ;;  %620 = vrcp.f32 %v464_v46 }
 0x1d5   : > { %v619_v48 = vpop.eup %618  ;;  %622 = vrcp.f32 %v465_v45  ;;  %v467_v49 = vadd.f32 1.0, %v617_v47 }
 0x1d6   : > { %v466_v50 = vadd.f32 1.0, %v619_v48 }
 0x1d8   : > { %624 = vrcp.f32 %v466_v50 }
 0x1d9   : > { %626 = vrcp.f32 %v467_v49 }
 0x1de   : > { %v621_v51 = vpop.eup %620 }
 0x1df   : > { %v623_v52 = vpop.eup %622  ;;  %473 = vst.msk [vmem:[%s226_s19] sm:$0xff] %vm472_vm2, %v621_v51 }
 0x1e0   : > { %474 = vst.msk [vmem:[%s226_s19 + $0x8] sm:$0xff] %vm472_vm2, %v623_v52 }
 0x1e2   : > { %v625_v53 = vpop.eup %624 }
 0x1e3   : > { %v627_v54 = vpop.eup %626  ;;  %475 = vst.msk [vmem:[%s226_s19 + $0x10] sm:$0xff] %vm472_vm2, %v625_v53 }
 0x1e4   : > { %476 = vst.msk [vmem:[%s226_s19 + $0x18] sm:$0xff] %vm472_vm2, %v627_v54 }
 0x1e5 PF: > { %s15_s18 = sadd.s32 1, %s634_s18  }
 0x1e6   : > { %p12_p4 = scmp.ge.s32.totalorder %s15_s18, 4  }
 0x1e8   :  { %14 = sbr.rel (!%p12_p4) target bundleno = 1 (0x1), region = 70 }

</bundles_post_ra>
